<compile_context>
chip_gen: v6e
topology: v6e:2x2x1
jax: 0.10.0
libtpu: 0.0.40
codegen_flags: <defaults>
</compile_context>

<pallas_src>
import math

import jax
import jax.numpy as jnp
from jax.experimental import pallas as pl
from jax.experimental.pallas import tpu as pltpu

GRID_SIZE = 5
SPLINE_ORDER = 3
NUM_COEFS = GRID_SIZE + SPLINE_ORDER              # 8
NUM_GRID_PTS = GRID_SIZE + 2 * SPLINE_ORDER + 1   # 12
GRID_RANGE = (-1.0, 1.0)

_H = (GRID_RANGE[1] - GRID_RANGE[0]) / GRID_SIZE
KNOTS = tuple((j - SPLINE_ORDER) * _H + GRID_RANGE[0] for j in range(NUM_GRID_PTS))
INV_H = 1.0 / _H


def kan_fused_kernel(x_ref, *refs):
    """Fused forward over all KANLinear layers for one batch tile.

    refs = (fused_w_0, fused_w_1, ..., o_ref)
    fused_w_l has shape (9*in_l, out_l): rows [0, 8*in) = c-major spline weight,
    rows [8*in, 9*in) = base_weight.T — matching feats = [bases | SiLU(x)].
    """
    o_ref = refs[-1]
    w_refs = refs[:-1]
    num_layers = len(w_refs)

    x = x_ref[...]                                      # (tile_b, in_0) f32
    for li in range(num_layers):
        in_f = x.shape[1]
        w = w_refs[li][...]                             # (9*in_f, out_f)

        silu_x = x * jax.nn.sigmoid(x)                  # base-branch activation

        # --- lane-dense closed-form uniform cubic B-spline bases (c-major) ---
        # Tile x across the 8 coefficient blocks once; every subsequent op runs
        # on fully occupied 128-lane vregs (same vreg count as computing narrow).
        xw = jnp.concatenate([x] * NUM_COEFS, axis=1)   # (tile_b, 8*in_f)
        s = (xw - KNOTS[0]) * INV_H                     # global knot parameter
        m = jnp.floor(s)                                # knot-interval index
        u = s - m                                       # local param in [0, 1)
        u2 = u * u
        u3 = u2 * u
        omu = 1.0 - u
        w0 = u3 * (1.0 / 6.0)                           # basis c with m - c == 0
        w3 = omu * omu * omu * (1.0 / 6.0)              # m - c == 3
        w2 = 0.5 * u3 - u2 + (2.0 / 3.0)                # m - c == 2
        w1 = 1.0 - w0 - w2 - w3                         # m - c == 1 (partition of unity)

        # Per-column coefficient index c (column j -> c = j // in_f), as a
        # (1, 8*in_f) float row; +0.5 keeps floor robust for non-pow2 in_f.
        lane = jax.lax.broadcasted_iota(jnp.int32, (1, NUM_COEFS * in_f), 1)
        c_col = jnp.floor((lane.astype(jnp.float32) + 0.5) * (1.0 / in_f))
        d = m - c_col
        bases = (jnp.where(d == 0.0, w0, 0.0)
                 + jnp.where(d == 1.0, w1, 0.0)
                 + jnp.where(d == 2.0, w2, 0.0)
                 + jnp.where(d == 3.0, w3, 0.0))        # (tile_b, 8*in_f)

        # --- single fused MXU call: [bases | SiLU(x)] @ [spline_w ; base_w] ---
        feats = jnp.concatenate([bases, silu_x], axis=1)   # (tile_b, 9*in_f)
        # TODO(synk): bf16 operand cast here on v6e/v7x once widths make the MXU
        # the bottleneck (would require relaxing the 1e-4 test tolerance).
        acc = jnp.dot(feats, w, preferred_element_type=jnp.float32)

        if li < num_layers - 1:
            acc = jnp.tanh(acc)                         # inter-layer activation
        x = acc

    o_ref[...] = x.astype(o_ref.dtype)


def _pick_tile_b(batch):
    """Small tile (vreg pressure) and >= 2 grid steps when possible (v7x megacore)."""
    if batch <= 8:
        return max(batch, 1)
    tb = (batch // 2) // 8 * 8
    return int(min(64, max(8, tb)))


def kan_forward(x, fused_params):
    """x: (batch, in_0) f32; fused_params: list of (9*in_l, out_l) fused weights."""
    batch, in0 = x.shape
    num_layers = len(fused_params)
    out_f = fused_params[-1].shape[1]

    # Lane-dense final store: pad last layer's out columns to a multiple of 128.
    out_pad = ((out_f + 127) // 128) * 128
    padded_params = list(fused_params[:-1]) + [
        jnp.pad(fused_params[-1], ((0, 0), (0, out_pad - out_f)))]

    # Batch tiling with zero-padding (no divisibility assert).
    tile_b = _pick_tile_b(batch)
    pb = ((batch + tile_b - 1) // tile_b) * tile_b
    x_pad = jnp.pad(x, ((0, pb - batch), (0, 0))) if pb != batch else x
    grid = (pb // tile_b,)

    # Advisory cost estimate for the XLA scheduler.
    flops, trans = 0, 0
    bytes_accessed = pb * in0 * 4 + pb * out_pad * 4
    cur_in = in0
    for li, w in enumerate(padded_params):
        k_dim, o_dim = w.shape
        flops += 2 * pb * k_dim * o_dim                  # fused matmul
        flops += 45 * pb * NUM_COEFS * cur_in            # lane-dense basis math
        trans += pb * cur_in                             # sigmoid
        if li < num_layers - 1:
            trans += pb * o_dim                          # tanh
        bytes_accessed += int(w.size) * 4
        cur_in = o_dim
    cost = pl.CostEstimate(flops=int(flops), transcendentals=int(trans),
                           bytes_accessed=int(bytes_accessed))

    weight_bytes = sum(int(w.size) * 4 for w in padded_params)
    vmem_limit = int(min(64 * 1024 * 1024, max(32 * 1024 * 1024, 4 * weight_bytes)))

    def _run(single_buffer_weights):
        w_kwargs = {}
        if single_buffer_weights:
            w_kwargs = dict(pipeline_mode=pl.Buffered(1))   # resident weights: 1 buffer
        in_specs = [pl.BlockSpec((tile_b, in0), lambda b: (b, 0))]
        for w in padded_params:
            in_specs.append(pl.BlockSpec(w.shape, lambda b: (0, 0), **w_kwargs))
        out_spec = pl.BlockSpec((tile_b, out_pad), lambda b: (b, 0))
        return pl.pallas_call(
            kan_fused_kernel,
            out_shape=jax.ShapeDtypeStruct((pb, out_pad), jnp.float32),
            grid=grid,
            in_specs=in_specs,
            out_specs=out_spec,
            compiler_params=pltpu.CompilerParams(
                dimension_semantics=("parallel",),
                vmem_limit_bytes=vmem_limit),
            cost_estimate=cost,
        )(x_pad, *padded_params)

    try:
        out = _run(True)
    except Exception:
        # pl.Buffered(1) is a pure VMEM optimization; fall back to default
        # double-buffering if this JAX version rejects single-buffered specs.
        out = _run(False)
    return out[:batch, :out_f]


def init_kan_params(key, layers_hidden, scale_base=1.0, scale_spline=1.0):
    """Deterministic synthetic init matching KANLinear parameter shapes, with the
    spline_scaler pre-fused and the per-layer weights pre-stacked for the kernel
    as (9*in, out) = [spline_w c-major flat ; base_weight.T]."""
    params = []
    for in_f, out_f in zip(layers_hidden[:-1], layers_hidden[1:]):
        key, k1, k2, k3 = jax.random.split(key, 4)
        a_b = math.sqrt(5.0) * scale_base
        bound_b = math.sqrt(6.0 / ((1.0 + a_b ** 2) * in_f))
        base_w = jax.random.uniform(k1, (out_f, in_f), jnp.float32, -bound_b, bound_b)
        # TODO(synk): PyTorch inits spline_weight via lstsq of noise (curve2coeff);
        # a small deterministic random init of identical shape stands in for it.
        spline_w = 0.1 * jax.random.normal(k2, (out_f, in_f, NUM_COEFS), jnp.float32)
        a_s = math.sqrt(5.0) * scale_spline
        bound_s = math.sqrt(6.0 / ((1.0 + a_s ** 2) * in_f))
        spline_scaler = jax.random.uniform(k3, (out_f, in_f), jnp.float32,
                                           -bound_s, bound_s)
        base_w_t = jnp.asarray(base_w.T)                                   # (in, out)
        sw = jnp.transpose(spline_w * spline_scaler[..., None], (2, 1, 0))  # (C, in, out)
        spline_w_flat = sw.reshape(NUM_COEFS * in_f, out_f)                 # c-major
        fused = jnp.concatenate([spline_w_flat, base_w_t], axis=0)          # (9*in, out)
        params.append(fused)
    return params


def kan_forward_ref(x, fused_params):
    """Pure-JAX reference mirroring the PyTorch forward (true Cox-de Boor recursion)."""
    grid_1d = jnp.asarray(KNOTS, jnp.float32)
    n = len(fused_params)
    for li, fw in enumerate(fused_params):
        in_f = x.shape[1]
        out_f = fw.shape[1]
        spline_w_flat = fw[:NUM_COEFS * in_f]                # (C*in, out), c-major
        base_w_t = fw[NUM_COEFS * in_f:]                     # (in, out)
        out = (x * jax.nn.sigmoid(x)) @ base_w_t
        g = jnp.broadcast_to(grid_1d, (in_f, NUM_GRID_PTS))  # (in, P)
        xe = x[:, :, None]
        bases = ((xe >= g[:, :-1]) & (xe < g[:, 1:])).astype(jnp.float32)
        for k in range(1, SPLINE_ORDER + 1):
            bases = ((xe - g[:, :-(k + 1)]) / (g[:, k:-1] - g[:, :-(k + 1)])
                     * bases[:, :, :-1]
                     + (g[:, k + 1:] - xe) / (g[:, k + 1:] - g[:, 1:-k])
                     * bases[:, :, 1:])
        sw = spline_w_flat.reshape(NUM_COEFS, in_f, out_f)
        out = out + jnp.einsum('bic,cio->bo', bases, sw)
        if li < n - 1:
            out = jnp.tanh(out)
        x = out
    return x


if __name__ == "__main__":
    key = jax.random.PRNGKey(0)
    layers_hidden = [16, 32, 8]

    kp, kx = jax.random.split(key)
    params = init_kan_params(kp, layers_hidden)

    # Small primary check (single tile).
    batch = 8
    x = jax.random.uniform(kx, (batch, layers_hidden[0]), jnp.float32, -1.0, 1.0)
    out = jax.block_until_ready(kan_forward(x, params))
    ref = jax.block_until_ready(kan_forward_ref(x, params))
    assert out.shape == (batch, layers_hidden[-1])
    assert jnp.allclose(out, ref, atol=1e-4, rtol=1e-4), \
        float(jnp.max(jnp.abs(out - ref)))

    # Secondary check exercising multi-tile grid + batch padding (batch % tile != 0).
    batch2 = 72
    x2 = jax.random.uniform(jax.random.PRNGKey(1), (batch2, layers_hidden[0]),
                            jnp.float32, -1.0, 1.0)
    out2 = jax.block_until_ready(kan_forward(x2, params))
    ref2 = jax.block_until_ready(kan_forward_ref(x2, params))
    assert out2.shape == (batch2, layers_hidden[-1])
    assert jnp.allclose(out2, ref2, atol=1e-4, rtol=1e-4), \
        float(jnp.max(jnp.abs(out2 - ref2)))

    print("KERNEL_OK")
</pallas_src>

<mosaic_0001>
module attributes {stable_mosaic.version = 11 : i64} {
  func.func @kan_fused_kernel(%arg0: i32, %arg1: memref<8x16xf32, #tpu.memory_space<vmem>>, %arg2: memref<144x32xf32, #tpu.memory_space<vmem>>, %arg3: memref<288x128xf32, #tpu.memory_space<vmem>>, %arg4: memref<8x128xf32, #tpu.memory_space<vmem>>) attributes {dimension_semantics = [#tpu.dimension_semantics<parallel>], iteration_bounds = array<i64: 1>, scalar_prefetch = 0 : i64, scratch_operands = 0 : i64, tpu.core_type = #tpu.core_type<tc>, window_params = [{transform_indices = @transform_0, window_bounds = array<i64: 8, 16>}, {pipeline_mode = #tpu.pipeline_mode<synchronous>, transform_indices = @transform_1, window_bounds = array<i64: 144, 32>}, {pipeline_mode = #tpu.pipeline_mode<synchronous>, transform_indices = @transform_2, window_bounds = array<i64: 288, 128>}, {transform_indices = @transform_3, window_bounds = array<i64: 8, 128>}]} {
    %c0 = arith.constant 0 : index
    %c0_0 = arith.constant 0 : index
    %0 = vector.load %arg1[%c0, %c0_0] : memref<8x16xf32, #tpu.memory_space<vmem>>, vector<8x16xf32>
    %c0_1 = arith.constant 0 : index
    %c0_2 = arith.constant 0 : index
    %1 = vector.load %arg2[%c0_1, %c0_2] : memref<144x32xf32, #tpu.memory_space<vmem>>, vector<144x32xf32>
    %2 = arith.negf %0 : vector<8x16xf32>
    %3 = math.exp %2 : vector<8x16xf32>
    %cst = arith.constant 1.000000e+00 : f32
    %4 = vector.broadcast %cst : f32 to vector<8x16xf32>
    %5 = arith.addf %4, %3 : vector<8x16xf32>
    %6 = arith.divf %4, %5 : vector<8x16xf32>
    %7 = arith.mulf %0, %6 : vector<8x16xf32>
    %8 = tpu.concatenate %0, %0, %0, %0, %0, %0, %0, %0 in 1 : vector<8x16xf32>, vector<8x16xf32>, vector<8x16xf32>, vector<8x16xf32>, vector<8x16xf32>, vector<8x16xf32>, vector<8x16xf32>, vector<8x16xf32> -> vector<8x128xf32>
    %cst_3 = arith.constant -2.200000e+00 : f32
    %9 = vector.broadcast %cst_3 : f32 to vector<8x128xf32>
    %10 = arith.subf %8, %9 : vector<8x128xf32>
    %cst_4 = arith.constant 2.500000e+00 : f32
    %11 = vector.broadcast %cst_4 : f32 to vector<8x128xf32>
    %12 = arith.mulf %10, %11 : vector<8x128xf32>
    %13 = math.floor %12 : vector<8x128xf32>
    %14 = arith.subf %12, %13 : vector<8x128xf32>
    %15 = arith.mulf %14, %14 : vector<8x128xf32>
    %16 = arith.mulf %15, %14 : vector<8x128xf32>
    %cst_5 = arith.constant 1.000000e+00 : f32
    %17 = vector.broadcast %cst_5 : f32 to vector<8x128xf32>
    %18 = arith.subf %17, %14 : vector<8x128xf32>
    %cst_6 = arith.constant 0.166666672 : f32
    %19 = vector.broadcast %cst_6 : f32 to vector<8x128xf32>
    %20 = arith.mulf %16, %19 : vector<8x128xf32>
    %21 = arith.mulf %18, %18 : vector<8x128xf32>
    %22 = arith.mulf %21, %18 : vector<8x128xf32>
    %cst_7 = arith.constant 0.166666672 : f32
    %23 = vector.broadcast %cst_7 : f32 to vector<8x128xf32>
    %24 = arith.mulf %22, %23 : vector<8x128xf32>
    %cst_8 = arith.constant 5.000000e-01 : f32
    %25 = vector.broadcast %cst_8 : f32 to vector<8x128xf32>
    %26 = arith.mulf %25, %16 : vector<8x128xf32>
    %27 = arith.subf %26, %15 : vector<8x128xf32>
    %cst_9 = arith.constant 0.666666686 : f32
    %28 = vector.broadcast %cst_9 : f32 to vector<8x128xf32>
    %29 = arith.addf %27, %28 : vector<8x128xf32>
    %cst_10 = arith.constant 1.000000e+00 : f32
    %30 = vector.broadcast %cst_10 : f32 to vector<8x128xf32>
    %31 = arith.subf %30, %20 : vector<8x128xf32>
    %32 = arith.subf %31, %29 : vector<8x128xf32>
    %33 = arith.subf %32, %24 : vector<8x128xf32>
    %34 = tpu.iota {dimensions = array<i32: 1>} : vector<1x128xi32>
    %35 = arith.sitofp %34 : vector<1x128xi32> to vector<1x128xf32>
    %cst_11 = arith.constant 5.000000e-01 : f32
    %36 = vector.broadcast %cst_11 : f32 to vector<1x128xf32>
    %37 = arith.addf %35, %36 : vector<1x128xf32>
    %cst_12 = arith.constant 6.250000e-02 : f32
    %38 = vector.broadcast %cst_12 : f32 to vector<1x128xf32>
    %39 = arith.mulf %37, %38 : vector<1x128xf32>
    %40 = math.floor %39 : vector<1x128xf32>
    %41 = vector.broadcast %40 : vector<1x128xf32> to vector<8x128xf32>
    %42 = arith.subf %13, %41 : vector<8x128xf32>
    %cst_13 = arith.constant 0.000000e+00 : f32
    %43 = vector.broadcast %cst_13 : f32 to vector<8x128xf32>
    %44 = arith.cmpf oeq, %42, %43 : vector<8x128xf32>
    %cst_14 = arith.constant 0.000000e+00 : f32
    %45 = vector.broadcast %cst_14 : f32 to vector<8x128xf32>
    %46 = arith.select %44, %20, %45 : vector<8x128xi1>, vector<8x128xf32>
    %cst_15 = arith.constant 1.000000e+00 : f32
    %47 = vector.broadcast %cst_15 : f32 to vector<8x128xf32>
    %48 = arith.cmpf oeq, %42, %47 : vector<8x128xf32>
    %cst_16 = arith.constant 0.000000e+00 : f32
    %49 = vector.broadcast %cst_16 : f32 to vector<8x128xf32>
    %50 = arith.select %48, %33, %49 : vector<8x128xi1>, vector<8x128xf32>
    %51 = arith.addf %46, %50 : vector<8x128xf32>
    %cst_17 = arith.constant 2.000000e+00 : f32
    %52 = vector.broadcast %cst_17 : f32 to vector<8x128xf32>
    %53 = arith.cmpf oeq, %42, %52 : vector<8x128xf32>
    %cst_18 = arith.constant 0.000000e+00 : f32
    %54 = vector.broadcast %cst_18 : f32 to vector<8x128xf32>
    %55 = arith.select %53, %29, %54 : vector<8x128xi1>, vector<8x128xf32>
    %56 = arith.addf %51, %55 : vector<8x128xf32>
    %cst_19 = arith.constant 3.000000e+00 : f32
    %57 = vector.broadcast %cst_19 : f32 to vector<8x128xf32>
    %58 = arith.cmpf oeq, %42, %57 : vector<8x128xf32>
    %cst_20 = arith.constant 0.000000e+00 : f32
    %59 = vector.broadcast %cst_20 : f32 to vector<8x128xf32>
    %60 = arith.select %58, %24, %59 : vector<8x128xi1>, vector<8x128xf32>
    %61 = arith.addf %56, %60 : vector<8x128xf32>
    %62 = tpu.concatenate %61, %7 in 1 : vector<8x128xf32>, vector<8x16xf32> -> vector<8x144xf32>
    %cst_21 = arith.constant dense<0.000000e+00> : vector<8x32xf32>
    %63 = tpu.matmul %62, %1, %cst_21 {dimension_numbers = #tpu.dot_dimension_numbers<[1], [0], [0], [1], [0, 0, 1, 1], [], []>} : vector<8x144xf32>, vector<144x32xf32>, vector<8x32xf32> -> vector<8x32xf32>
    %64 = math.tanh %63 : vector<8x32xf32>
    %c0_22 = arith.constant 0 : index
    %c0_23 = arith.constant 0 : index
    %65 = vector.load %arg3[%c0_22, %c0_23] : memref<288x128xf32, #tpu.memory_space<vmem>>, vector<288x128xf32>
    %66 = arith.negf %64 : vector<8x32xf32>
    %67 = math.exp %66 : vector<8x32xf32>
    %cst_24 = arith.constant 1.000000e+00 : f32
    %68 = vector.broadcast %cst_24 : f32 to vector<8x32xf32>
    %69 = arith.addf %68, %67 : vector<8x32xf32>
    %70 = arith.divf %68, %69 : vector<8x32xf32>
    %71 = arith.mulf %64, %70 : vector<8x32xf32>
    %72 = tpu.concatenate %64, %64, %64, %64, %64, %64, %64, %64 in 1 : vector<8x32xf32>, vector<8x32xf32>, vector<8x32xf32>, vector<8x32xf32>, vector<8x32xf32>, vector<8x32xf32>, vector<8x32xf32>, vector<8x32xf32> -> vector<8x256xf32>
    %cst_25 = arith.constant -2.200000e+00 : f32
    %73 = vector.broadcast %cst_25 : f32 to vector<8x256xf32>
    %74 = arith.subf %72, %73 : vector<8x256xf32>
    %cst_26 = arith.constant 2.500000e+00 : f32
    %75 = vector.broadcast %cst_26 : f32 to vector<8x256xf32>
    %76 = arith.mulf %74, %75 : vector<8x256xf32>
    %77 = math.floor %76 : vector<8x256xf32>
    %78 = arith.subf %76, %77 : vector<8x256xf32>
    %79 = arith.mulf %78, %78 : vector<8x256xf32>
    %80 = arith.mulf %79, %78 : vector<8x256xf32>
    %cst_27 = arith.constant 1.000000e+00 : f32
    %81 = vector.broadcast %cst_27 : f32 to vector<8x256xf32>
    %82 = arith.subf %81, %78 : vector<8x256xf32>
    %cst_28 = arith.constant 0.166666672 : f32
    %83 = vector.broadcast %cst_28 : f32 to vector<8x256xf32>
    %84 = arith.mulf %80, %83 : vector<8x256xf32>
    %85 = arith.mulf %82, %82 : vector<8x256xf32>
    %86 = arith.mulf %85, %82 : vector<8x256xf32>
    %cst_29 = arith.constant 0.166666672 : f32
    %87 = vector.broadcast %cst_29 : f32 to vector<8x256xf32>
    %88 = arith.mulf %86, %87 : vector<8x256xf32>
    %cst_30 = arith.constant 5.000000e-01 : f32
    %89 = vector.broadcast %cst_30 : f32 to vector<8x256xf32>
    %90 = arith.mulf %89, %80 : vector<8x256xf32>
    %91 = arith.subf %90, %79 : vector<8x256xf32>
    %cst_31 = arith.constant 0.666666686 : f32
    %92 = vector.broadcast %cst_31 : f32 to vector<8x256xf32>
    %93 = arith.addf %91, %92 : vector<8x256xf32>
    %cst_32 = arith.constant 1.000000e+00 : f32
    %94 = vector.broadcast %cst_32 : f32 to vector<8x256xf32>
    %95 = arith.subf %94, %84 : vector<8x256xf32>
    %96 = arith.subf %95, %93 : vector<8x256xf32>
    %97 = arith.subf %96, %88 : vector<8x256xf32>
    %98 = tpu.iota {dimensions = array<i32: 1>} : vector<1x256xi32>
    %99 = arith.sitofp %98 : vector<1x256xi32> to vector<1x256xf32>
    %cst_33 = arith.constant 5.000000e-01 : f32
    %100 = vector.broadcast %cst_33 : f32 to vector<1x256xf32>
    %101 = arith.addf %99, %100 : vector<1x256xf32>
    %cst_34 = arith.constant 3.125000e-02 : f32
    %102 = vector.broadcast %cst_34 : f32 to vector<1x256xf32>
    %103 = arith.mulf %101, %102 : vector<1x256xf32>
    %104 = math.floor %103 : vector<1x256xf32>
    %105 = vector.broadcast %104 : vector<1x256xf32> to vector<8x256xf32>
    %106 = arith.subf %77, %105 : vector<8x256xf32>
    %cst_35 = arith.constant 0.000000e+00 : f32
    %107 = vector.broadcast %cst_35 : f32 to vector<8x256xf32>
    %108 = arith.cmpf oeq, %106, %107 : vector<8x256xf32>
    %cst_36 = arith.constant 0.000000e+00 : f32
    %109 = vector.broadcast %cst_36 : f32 to vector<8x256xf32>
    %110 = arith.select %108, %84, %109 : vector<8x256xi1>, vector<8x256xf32>
    %cst_37 = arith.constant 1.000000e+00 : f32
    %111 = vector.broadcast %cst_37 : f32 to vector<8x256xf32>
    %112 = arith.cmpf oeq, %106, %111 : vector<8x256xf32>
    %cst_38 = arith.constant 0.000000e+00 : f32
    %113 = vector.broadcast %cst_38 : f32 to vector<8x256xf32>
    %114 = arith.select %112, %97, %113 : vector<8x256xi1>, vector<8x256xf32>
    %115 = arith.addf %110, %114 : vector<8x256xf32>
    %cst_39 = arith.constant 2.000000e+00 : f32
    %116 = vector.broadcast %cst_39 : f32 to vector<8x256xf32>
    %117 = arith.cmpf oeq, %106, %116 : vector<8x256xf32>
    %cst_40 = arith.constant 0.000000e+00 : f32
    %118 = vector.broadcast %cst_40 : f32 to vector<8x256xf32>
    %119 = arith.select %117, %93, %118 : vector<8x256xi1>, vector<8x256xf32>
    %120 = arith.addf %115, %119 : vector<8x256xf32>
    %cst_41 = arith.constant 3.000000e+00 : f32
    %121 = vector.broadcast %cst_41 : f32 to vector<8x256xf32>
    %122 = arith.cmpf oeq, %106, %121 : vector<8x256xf32>
    %cst_42 = arith.constant 0.000000e+00 : f32
    %123 = vector.broadcast %cst_42 : f32 to vector<8x256xf32>
    %124 = arith.select %122, %88, %123 : vector<8x256xi1>, vector<8x256xf32>
    %125 = arith.addf %120, %124 : vector<8x256xf32>
    %126 = tpu.concatenate %125, %71 in 1 : vector<8x256xf32>, vector<8x32xf32> -> vector<8x288xf32>
    %cst_43 = arith.constant dense<0.000000e+00> : vector<8x128xf32>
    %127 = tpu.matmul %126, %65, %cst_43 {dimension_numbers = #tpu.dot_dimension_numbers<[1], [0], [0], [1], [0, 0, 1, 1], [], []>} : vector<8x288xf32>, vector<288x128xf32>, vector<8x128xf32> -> vector<8x128xf32>
    %c0_44 = arith.constant 0 : index
    %c0_45 = arith.constant 0 : index
    %128 = vector.load %arg4[%c0_44, %c0_45] : memref<8x128xf32, #tpu.memory_space<vmem>>, vector<8x128xf32>
    tpu.vector_store %arg4[%c0_44, %c0_45], %127 {strides = array<i32>} : memref<8x128xf32, #tpu.memory_space<vmem>>, vector<8x128xf32>,
    return
  }
  func.func @transform_0(%arg0: i32) -> (i32, i32) {
    %c0_i32 = arith.constant 0 : i32
    %c0_i32_0 = arith.constant 0 : i32
    return %arg0, %c0_i32 : i32, i32
  }
  func.func @transform_1(%arg0: i32) -> (i32, i32) {
    %c0_i32 = arith.constant 0 : i32
    %c0_i32_0 = arith.constant 0 : i32
    %c0_i32_1 = arith.constant 0 : i32
    return %c0_i32, %c0_i32_0 : i32, i32
  }
  func.func @transform_2(%arg0: i32) -> (i32, i32) {
    %c0_i32 = arith.constant 0 : i32
    %c0_i32_0 = arith.constant 0 : i32
    %c0_i32_1 = arith.constant 0 : i32
    return %c0_i32, %c0_i32_0 : i32, i32
  }
  func.func @transform_3(%arg0: i32) -> (i32, i32) {
    %c0_i32 = arith.constant 0 : i32
    %c0_i32_0 = arith.constant 0 : i32
    return %arg0, %c0_i32 : i32, i32
  }
}

module attributes {stable_mosaic.version = 11 : i64} {
  func.func @kan_fused_kernel(%arg0: i32, %arg1: memref<8x16xf32, #tpu.memory_space<vmem>>, %arg2: memref<144x32xf32, #tpu.memory_space<vmem>>, %arg3: memref<288x128xf32, #tpu.memory_space<vmem>>, %arg4: memref<8x128xf32, #tpu.memory_space<vmem>>) attributes {dimension_semantics = [#tpu.dimension_semantics<parallel>], iteration_bounds = array<i64: 1>, scalar_prefetch = 0 : i64, scratch_operands = 0 : i64, tpu.core_type = #tpu.core_type<tc>, window_params = [{transform_indices = @transform_0, window_bounds = array<i64: 8, 16>}, {pipeline_mode = #tpu.pipeline_mode<synchronous>, transform_indices = @transform_1, window_bounds = array<i64: 144, 32>}, {pipeline_mode = #tpu.pipeline_mode<synchronous>, transform_indices = @transform_2, window_bounds = array<i64: 288, 128>}, {transform_indices = @transform_3, window_bounds = array<i64: 8, 128>}]} {
    %c0 = arith.constant 0 : index
    %c0_0 = arith.constant 0 : index
    %0 = vector.load %arg1[%c0, %c0_0] : memref<8x16xf32, #tpu.memory_space<vmem>>, vector<8x16xf32>
    %c0_1 = arith.constant 0 : index
    %c0_2 = arith.constant 0 : index
    %1 = vector.load %arg2[%c0_1, %c0_2] : memref<144x32xf32, #tpu.memory_space<vmem>>, vector<144x32xf32>
    %2 = arith.negf %0 : vector<8x16xf32>
    %3 = math.exp %2 : vector<8x16xf32>
    %cst = arith.constant 1.000000e+00 : f32
    %4 = vector.broadcast %cst : f32 to vector<8x16xf32>
    %5 = arith.addf %4, %3 : vector<8x16xf32>
    %6 = arith.divf %4, %5 : vector<8x16xf32>
    %7 = arith.mulf %0, %6 : vector<8x16xf32>
    %8 = tpu.concatenate %0, %0, %0, %0, %0, %0, %0, %0 in 1 : vector<8x16xf32>, vector<8x16xf32>, vector<8x16xf32>, vector<8x16xf32>, vector<8x16xf32>, vector<8x16xf32>, vector<8x16xf32>, vector<8x16xf32> -> vector<8x128xf32>
    %cst_3 = arith.constant -2.200000e+00 : f32
    %9 = vector.broadcast %cst_3 : f32 to vector<8x128xf32>
    %10 = arith.subf %8, %9 : vector<8x128xf32>
    %cst_4 = arith.constant 2.500000e+00 : f32
    %11 = vector.broadcast %cst_4 : f32 to vector<8x128xf32>
    %12 = arith.mulf %10, %11 : vector<8x128xf32>
    %13 = math.floor %12 : vector<8x128xf32>
    %14 = arith.subf %12, %13 : vector<8x128xf32>
    %15 = arith.mulf %14, %14 : vector<8x128xf32>
    %16 = arith.mulf %15, %14 : vector<8x128xf32>
    %cst_5 = arith.constant 1.000000e+00 : f32
    %17 = vector.broadcast %cst_5 : f32 to vector<8x128xf32>
    %18 = arith.subf %17, %14 : vector<8x128xf32>
    %cst_6 = arith.constant 0.166666672 : f32
    %19 = vector.broadcast %cst_6 : f32 to vector<8x128xf32>
    %20 = arith.mulf %16, %19 : vector<8x128xf32>
    %21 = arith.mulf %18, %18 : vector<8x128xf32>
    %22 = arith.mulf %21, %18 : vector<8x128xf32>
    %cst_7 = arith.constant 0.166666672 : f32
    %23 = vector.broadcast %cst_7 : f32 to vector<8x128xf32>
    %24 = arith.mulf %22, %23 : vector<8x128xf32>
    %cst_8 = arith.constant 5.000000e-01 : f32
    %25 = vector.broadcast %cst_8 : f32 to vector<8x128xf32>
    %26 = arith.mulf %25, %16 : vector<8x128xf32>
    %27 = arith.subf %26, %15 : vector<8x128xf32>
    %cst_9 = arith.constant 0.666666686 : f32
    %28 = vector.broadcast %cst_9 : f32 to vector<8x128xf32>
    %29 = arith.addf %27, %28 : vector<8x128xf32>
    %cst_10 = arith.constant 1.000000e+00 : f32
    %30 = vector.broadcast %cst_10 : f32 to vector<8x128xf32>
    %31 = arith.subf %30, %20 : vector<8x128xf32>
    %32 = arith.subf %31, %29 : vector<8x128xf32>
    %33 = arith.subf %32, %24 : vector<8x128xf32>
    %34 = tpu.iota {dimensions = array<i32: 1>} : vector<1x128xi32>
    %35 = arith.sitofp %34 : vector<1x128xi32> to vector<1x128xf32>
    %cst_11 = arith.constant 5.000000e-01 : f32
    %36 = vector.broadcast %cst_11 : f32 to vector<1x128xf32>
    %37 = arith.addf %35, %36 : vector<1x128xf32>
    %cst_12 = arith.constant 6.250000e-02 : f32
    %38 = vector.broadcast %cst_12 : f32 to vector<1x128xf32>
    %39 = arith.mulf %37, %38 : vector<1x128xf32>
    %40 = math.floor %39 : vector<1x128xf32>
    %41 = vector.broadcast %40 : vector<1x128xf32> to vector<8x128xf32>
    %42 = arith.subf %13, %41 : vector<8x128xf32>
    %cst_13 = arith.constant 0.000000e+00 : f32
    %43 = vector.broadcast %cst_13 : f32 to vector<8x128xf32>
    %44 = arith.cmpf oeq, %42, %43 : vector<8x128xf32>
    %cst_14 = arith.constant 0.000000e+00 : f32
    %45 = vector.broadcast %cst_14 : f32 to vector<8x128xf32>
    %46 = arith.select %44, %20, %45 : vector<8x128xi1>, vector<8x128xf32>
    %cst_15 = arith.constant 1.000000e+00 : f32
    %47 = vector.broadcast %cst_15 : f32 to vector<8x128xf32>
    %48 = arith.cmpf oeq, %42, %47 : vector<8x128xf32>
    %cst_16 = arith.constant 0.000000e+00 : f32
    %49 = vector.broadcast %cst_16 : f32 to vector<8x128xf32>
    %50 = arith.select %48, %33, %49 : vector<8x128xi1>, vector<8x128xf32>
    %51 = arith.addf %46, %50 : vector<8x128xf32>
    %cst_17 = arith.constant 2.000000e+00 : f32
    %52 = vector.broadcast %cst_17 : f32 to vector<8x128xf32>
    %53 = arith.cmpf oeq, %42, %52 : vector<8x128xf32>
    %cst_18 = arith.constant 0.000000e+00 : f32
    %54 = vector.broadcast %cst_18 : f32 to vector<8x128xf32>
    %55 = arith.select %53, %29, %54 : vector<8x128xi1>, vector<8x128xf32>
    %56 = arith.addf %51, %55 : vector<8x128xf32>
    %cst_19 = arith.constant 3.000000e+00 : f32
    %57 = vector.broadcast %cst_19 : f32 to vector<8x128xf32>
    %58 = arith.cmpf oeq, %42, %57 : vector<8x128xf32>
    %cst_20 = arith.constant 0.000000e+00 : f32
    %59 = vector.broadcast %cst_20 : f32 to vector<8x128xf32>
    %60 = arith.select %58, %24, %59 : vector<8x128xi1>, vector<8x128xf32>
    %61 = arith.addf %56, %60 : vector<8x128xf32>
    %62 = tpu.concatenate %61, %7 in 1 : vector<8x128xf32>, vector<8x16xf32> -> vector<8x144xf32>
    %cst_21 = arith.constant dense<0.000000e+00> : vector<8x32xf32>
    %63 = tpu.matmul %62, %1, %cst_21 {dimension_numbers = #tpu.dot_dimension_numbers<[1], [0], [0], [1], [0, 0, 1, 1], [], []>} : vector<8x144xf32>, vector<144x32xf32>, vector<8x32xf32> -> vector<8x32xf32>
    %64 = math.tanh %63 : vector<8x32xf32>
    %c0_22 = arith.constant 0 : index
    %c0_23 = arith.constant 0 : index
    %65 = vector.load %arg3[%c0_22, %c0_23] : memref<288x128xf32, #tpu.memory_space<vmem>>, vector<288x128xf32>
    %66 = arith.negf %64 : vector<8x32xf32>
    %67 = math.exp %66 : vector<8x32xf32>
    %cst_24 = arith.constant 1.000000e+00 : f32
    %68 = vector.broadcast %cst_24 : f32 to vector<8x32xf32>
    %69 = arith.addf %68, %67 : vector<8x32xf32>
    %70 = arith.divf %68, %69 : vector<8x32xf32>
    %71 = arith.mulf %64, %70 : vector<8x32xf32>
    %72 = tpu.concatenate %64, %64, %64, %64, %64, %64, %64, %64 in 1 : vector<8x32xf32>, vector<8x32xf32>, vector<8x32xf32>, vector<8x32xf32>, vector<8x32xf32>, vector<8x32xf32>, vector<8x32xf32>, vector<8x32xf32> -> vector<8x256xf32>
    %cst_25 = arith.constant -2.200000e+00 : f32
    %73 = vector.broadcast %cst_25 : f32 to vector<8x256xf32>
    %74 = arith.subf %72, %73 : vector<8x256xf32>
    %cst_26 = arith.constant 2.500000e+00 : f32
    %75 = vector.broadcast %cst_26 : f32 to vector<8x256xf32>
    %76 = arith.mulf %74, %75 : vector<8x256xf32>
    %77 = math.floor %76 : vector<8x256xf32>
    %78 = arith.subf %76, %77 : vector<8x256xf32>
    %79 = arith.mulf %78, %78 : vector<8x256xf32>
    %80 = arith.mulf %79, %78 : vector<8x256xf32>
    %cst_27 = arith.constant 1.000000e+00 : f32
    %81 = vector.broadcast %cst_27 : f32 to vector<8x256xf32>
    %82 = arith.subf %81, %78 : vector<8x256xf32>
    %cst_28 = arith.constant 0.166666672 : f32
    %83 = vector.broadcast %cst_28 : f32 to vector<8x256xf32>
    %84 = arith.mulf %80, %83 : vector<8x256xf32>
    %85 = arith.mulf %82, %82 : vector<8x256xf32>
    %86 = arith.mulf %85, %82 : vector<8x256xf32>
    %cst_29 = arith.constant 0.166666672 : f32
    %87 = vector.broadcast %cst_29 : f32 to vector<8x256xf32>
    %88 = arith.mulf %86, %87 : vector<8x256xf32>
    %cst_30 = arith.constant 5.000000e-01 : f32
    %89 = vector.broadcast %cst_30 : f32 to vector<8x256xf32>
    %90 = arith.mulf %89, %80 : vector<8x256xf32>
    %91 = arith.subf %90, %79 : vector<8x256xf32>
    %cst_31 = arith.constant 0.666666686 : f32
    %92 = vector.broadcast %cst_31 : f32 to vector<8x256xf32>
    %93 = arith.addf %91, %92 : vector<8x256xf32>
    %cst_32 = arith.constant 1.000000e+00 : f32
    %94 = vector.broadcast %cst_32 : f32 to vector<8x256xf32>
    %95 = arith.subf %94, %84 : vector<8x256xf32>
    %96 = arith.subf %95, %93 : vector<8x256xf32>
    %97 = arith.subf %96, %88 : vector<8x256xf32>
    %98 = tpu.iota {dimensions = array<i32: 1>} : vector<1x256xi32>
    %99 = arith.sitofp %98 : vector<1x256xi32> to vector<1x256xf32>
    %cst_33 = arith.constant 5.000000e-01 : f32
    %100 = vector.broadcast %cst_33 : f32 to vector<1x256xf32>
    %101 = arith.addf %99, %100 : vector<1x256xf32>
    %cst_34 = arith.constant 3.125000e-02 : f32
    %102 = vector.broadcast %cst_34 : f32 to vector<1x256xf32>
    %103 = arith.mulf %101, %102 : vector<1x256xf32>
    %104 = math.floor %103 : vector<1x256xf32>
    %105 = vector.broadcast %104 : vector<1x256xf32> to vector<8x256xf32>
    %106 = arith.subf %77, %105 : vector<8x256xf32>
    %cst_35 = arith.constant 0.000000e+00 : f32
    %107 = vector.broadcast %cst_35 : f32 to vector<8x256xf32>
    %108 = arith.cmpf oeq, %106, %107 : vector<8x256xf32>
    %cst_36 = arith.constant 0.000000e+00 : f32
    %109 = vector.broadcast %cst_36 : f32 to vector<8x256xf32>
    %110 = arith.select %108, %84, %109 : vector<8x256xi1>, vector<8x256xf32>
    %cst_37 = arith.constant 1.000000e+00 : f32
    %111 = vector.broadcast %cst_37 : f32 to vector<8x256xf32>
    %112 = arith.cmpf oeq, %106, %111 : vector<8x256xf32>
    %cst_38 = arith.constant 0.000000e+00 : f32
    %113 = vector.broadcast %cst_38 : f32 to vector<8x256xf32>
    %114 = arith.select %112, %97, %113 : vector<8x256xi1>, vector<8x256xf32>
    %115 = arith.addf %110, %114 : vector<8x256xf32>
    %cst_39 = arith.constant 2.000000e+00 : f32
    %116 = vector.broadcast %cst_39 : f32 to vector<8x256xf32>
    %117 = arith.cmpf oeq, %106, %116 : vector<8x256xf32>
    %cst_40 = arith.constant 0.000000e+00 : f32
    %118 = vector.broadcast %cst_40 : f32 to vector<8x256xf32>
    %119 = arith.select %117, %93, %118 : vector<8x256xi1>, vector<8x256xf32>
    %120 = arith.addf %115, %119 : vector<8x256xf32>
    %cst_41 = arith.constant 3.000000e+00 : f32
    %121 = vector.broadcast %cst_41 : f32 to vector<8x256xf32>
    %122 = arith.cmpf oeq, %106, %121 : vector<8x256xf32>
    %cst_42 = arith.constant 0.000000e+00 : f32
    %123 = vector.broadcast %cst_42 : f32 to vector<8x256xf32>
    %124 = arith.select %122, %88, %123 : vector<8x256xi1>, vector<8x256xf32>
    %125 = arith.addf %120, %124 : vector<8x256xf32>
    %126 = tpu.concatenate %125, %71 in 1 : vector<8x256xf32>, vector<8x32xf32> -> vector<8x288xf32>
    %cst_43 = arith.constant dense<0.000000e+00> : vector<8x128xf32>
    %127 = tpu.matmul %126, %65, %cst_43 {dimension_numbers = #tpu.dot_dimension_numbers<[1], [0], [0], [1], [0, 0, 1, 1], [], []>} : vector<8x288xf32>, vector<288x128xf32>, vector<8x128xf32> -> vector<8x128xf32>
    %c0_44 = arith.constant 0 : index
    %c0_45 = arith.constant 0 : index
    %128 = vector.load %arg4[%c0_44, %c0_45] : memref<8x128xf32, #tpu.memory_space<vmem>>, vector<8x128xf32>
    tpu.vector_store %arg4[%c0_44, %c0_45], %127 {strides = array<i32>} : memref<8x128xf32, #tpu.memory_space<vmem>>, vector<8x128xf32>,
    return
  }
  func.func @transform_0(%arg0: i32) -> (i32, i32) {
    %c0_i32 = arith.constant 0 : i32
    %c0_i32_0 = arith.constant 0 : i32
    return %arg0, %c0_i32 : i32, i32
  }
  func.func @transform_1(%arg0: i32) -> (i32, i32) {
    %c0_i32 = arith.constant 0 : i32
    %c0_i32_0 = arith.constant 0 : i32
    %c0_i32_1 = arith.constant 0 : i32
    return %c0_i32, %c0_i32_0 : i32, i32
  }
  func.func @transform_2(%arg0: i32) -> (i32, i32) {
    %c0_i32 = arith.constant 0 : i32
    %c0_i32_0 = arith.constant 0 : i32
    %c0_i32_1 = arith.constant 0 : i32
    return %c0_i32, %c0_i32_0 : i32, i32
  }
  func.func @transform_3(%arg0: i32) -> (i32, i32) {
    %c0_i32 = arith.constant 0 : i32
    %c0_i32_0 = arith.constant 0 : i32
    return %arg0, %c0_i32 : i32, i32
  }
}

</mosaic_0001>

<bundles_post_ra>
// kernel: tpu_custom_call.1
= control target key start
LH: loop header
LB: loop body
LE: loop exit
PB: predicated region body
PF: predicated region fallthrough
CT: control target
= control target key end

     0   :  { %8 = vsyncpa [#allocation3], 0  ;;  %s747_s0 = inlined_call_operand.vmem [shape: f32[8,16], index: 0, kind: input, shape index: {}]   ;;  %s748_s1 = inlined_call_operand.vmem [shape: f32[144,32], index: 1, kind: input, shape index: {}]   ;;  %s749_s2 = inlined_call_operand.hbm [shape: f32[288,128], index: 2, kind: input, shape index: {}]   ;;  %s750_s3 = inlined_call_operand.hbm [shape: f32[8,128], index: 3, kind: output, shape index: {}]  }
   0x1   :  { %9 = vsyncpa [#allocation4], 0  ;;  %s587_s12 = smov [#allocation2]  }
   0x2   :  { %s19_s13 = sshll.u32 %s587_s12, 4  ;;  %s20_s13 = int_to_ptr.vmem [resolvable:$true] %s19_s13 }
   0x3   :  { %s551_s14 = scalar_lea.vmem %s20_s13, 4608  ;;  %p556_p1 = scmp.lt.s32.totalorder %s20_s13, %s20_s13 }
   0x4   :  { %p552_p0 = scmp.ne.s32.totalorder %s20_s13, %s551_s14  ;;  %p557_p2 = scmp.lt.s32.totalorder %s551_s14, %s551_s14 }
   0x6   :  { %p558_p3 = por %p557_p2, %p556_p1 }
   0x8   :  { %p559_p4 = pnand %p558_p3, %p552_p0 }
   0xa   :  { %562 = shalt.err (!%p559_p4)
}
   0xb   :  { %s588_s15 = smov 128   ;;  %s589_s16 = smov 8  }
   0xc   :  { %25 = dma.hbm_to_vmem [thread:$0]  %s749_s2, 4608, %s20_s13, [#allocation3], %s588_s15, %s588_s15, %s589_s16  }
   0xd   :  { %583 = dma.done.wait [#allocation3], 4608  }
   0xe   :  { %584 = vsyncadd [#allocation3], 4294962688  ;;  %v590_v0 = vmov 0.0   ;;  %v627_v1 = vld [vmem:[%s747_s0] sm:$0xff]  ;;  %v45_v2 = vld [vmem:[%s748_s1 + $0x78] sm:$0xff]  ;;  %s591_s23 = smov 16   ;;  %v108_v33 = vlaneseq }
   0xf   :  { %129 = vmatprep.subr.mxu0 %v590_v0  ;;  %56 = vrot.lane.b32.xlu0 %v627_v1, %s591_s23  ;;  %s592_s24 = smov 48   ;;  %v44_v3 = vld [vmem:[%s748_s1 + $0x70] sm:$0xff]  ;;  %v463_v4 = vmul.f32 -1.442695, %v627_v1  ;;  %v43_v5 = vld [vmem:[%s748_s1 + $0x68] sm:$0xff]  ;;  %s593_s27 = smov 32  }
  0x10   :  { %62 = vrot.lane.b32.xlu1 %v627_v1, %s592_s24  ;;  %130 = vmatpush1.msra.mxu0 %v45_v2  ;;  %s594_s28 = smov 64   ;;  %v42_v6 = vld [vmem:[%s748_s1 + $0x60] sm:$0xff]  ;;  %s595_s4 = smov 80   ;;  %v41_v7 = vld [vmem:[%s748_s1 + $0x58] sm:$0xff]  ;;  %v40_v8 = vld [vmem:[%s748_s1 + $0x50] sm:$0xff]  ;;  %vm77_vm0 = vcmask 130048  }
  0x11   :  { %131 = vmatprep.subr.mxu0 %v590_v0  ;;  %533 = vpow2.f32 %v463_v4  ;;  %s596_s5 = smov 96   ;;  %s597_s10 = smov 112   ;;  %v39_v9 = vld [vmem:[%s748_s1 + $0x48] sm:$0xff]  ;;  %v38_v10 = vld [vmem:[%s748_s1 + $0x40] sm:$0xff]  ;;  %v37_v12 = vld [vmem:[%s748_s1 + $0x38] sm:$0xff]  ;;  %vm79_vm1 = vcmask 261120  }
  0x12   :  { %132 = vmatpush1.msra.mxu0 %v44_v3  ;;  %v36_v14 = vld [vmem:[%s748_s1 + $0x30] sm:$0xff]  ;;  %v35_v15 = vld [vmem:[%s748_s1 + $0x28] sm:$0xff]  ;;  %v34_v16 = vld [vmem:[%s748_s1 + $0x20] sm:$0xff]  ;;  %vm81_vm2 = vcmask 392192   ;;  %vm83_vm3 = vcmask 523264   ;;  %vm85_vm4 = vcmask 654336  }
  0x13   :  { %59 = vrot.lane.b32.xlu0 %v627_v1, %s593_s27  ;;  %133 = vmatprep.subr.mxu0 %v590_v0  ;;  %v33_v17 = vld [vmem:[%s748_s1 + $0x18] sm:$0xff]  ;;  %v32_v18 = vld [vmem:[%s748_s1 + $0x10] sm:$0xff]  ;;  %v31_v19 = vld [vmem:[%s748_s1 + $0x8] sm:$0xff]  ;;  %vm87_vm5 = vcmask 785408   ;;  %vm89_vm6 = vcmask 916480   ;;  %v715_v37 = vand.u32 127, %v108_v33 }
  0x14   :  { %65 = vrot.lane.b32.xlu1 %v627_v1, %s594_s28  ;;  %134 = vmatpush1.msra.mxu0 %v43_v5  ;;  %v30_v20 = vld [vmem:[%s748_s1] sm:$0xff]  ;;  %v47_v22 = vld [vmem:[%s748_s1 + $0x88] sm:$0xff] }
  0x15   :  { %135 = vmatprep.subr.mxu0 %v590_v0  ;;  %v46_v24 = vld [vmem:[%s748_s1 + $0x80] sm:$0xff]  ;;  %v110_v42 = vcvt.s32.f32 %v715_v37  ;;  %s599_s1 = smov [#allocation5]  }
  0x16   :  { %136 = vmatpush1.msra.mxu0 %v42_v6  ;;  %v204_v33 = vld [vmem:[#allocation2 + $0x20] sm:$0xff] }
  0x17   :  { %68 = vrot.lane.b32.xlu0 %v627_v1, %s595_s4  ;;  %137 = vmatprep.subr.mxu0 %v590_v0  ;;  %v719_v45 = vadd.f32 0.5, %v110_v42  ;;  %v200_v42 = vld [vmem:[#allocation2] sm:$0xff] }
  0x18   :  { %71 = vrot.lane.b32.xlu1 %v627_v1, %s596_s5  ;;  %138 = vmatpush1.msra.mxu0 %v41_v7 }
  0x19   :  { %139 = vmatprep.subr.mxu0 %v590_v0  ;;  %v112_v49 = vmul.f32 0.0625, %v719_v45 }
  0x1a   :  { %140 = vmatpush1.msra.mxu0 %v40_v8 }
  0x1b   :  { %74 = vrot.lane.b32.xlu0 %v627_v1, %s597_s10  ;;  %141 = vmatprep.subr.mxu0 %v590_v0  ;;  %v113_v54 = vfloor.f32 %v112_v49 }
  0x1c   :  { %142 = vmatpush1.msra.mxu0 %v39_v9  ;;  %v231_v9 = vld [vmem:[#allocation2 + $0xf8] sm:$0xff] }
  0x1d   :  { %143 = vmatprep.subr.mxu0 %v590_v0  ;;  %469 = vmatprep.subr.mxu1 %v231_v9 }
  0x1e   :  { %v534_v11 = vpop.eup %533  ;;  %144 = vmatpush1.msra.mxu0 %v38_v10  ;;  %v215_v10 = vld [vmem:[#allocation2 + $0x78] sm:$0xff] }
  0x1f   :  { %v51_v13 = vadd.f32 1.0, %v534_v11  ;;  %145 = vmatprep.subr.mxu0 %v590_v0  ;;  %470 = vmatpush3.msra.mxu1 %v215_v10  ;;  %v230_v11 = vld [vmem:[#allocation2 + $0xf0] sm:$0xff] }
  0x20   :  { %146 = vmatpush1.msra.mxu0 %v37_v12  ;;  %471 = vmatprep.subr.mxu1 %v230_v11  ;;  %v214_v12 = vld [vmem:[#allocation2 + $0x70] sm:$0xff] }
  0x21   :  { %535 = vrcp.f32 %v51_v13  ;;  %147 = vmatprep.subr.mxu0 %v590_v0  ;;  %472 = vmatpush3.msra.mxu1 %v214_v12  ;;  %v229_v13 = vld [vmem:[#allocation2 + $0xe8] sm:$0xff] }
  0x22   :  { %148 = vmatpush1.msra.mxu0 %v36_v14  ;;  %473 = vmatprep.subr.mxu1 %v229_v13  ;;  %v213_v14 = vld [vmem:[#allocation2 + $0x68] sm:$0xff] }
  0x23   :  { %149 = vmatprep.subr.mxu0 %v590_v0  ;;  %474 = vmatpush3.msra.mxu1 %v213_v14 }
  0x24   :  { %150 = vmatpush1.msra.mxu0 %v35_v15  ;;  %v228_v15 = vld [vmem:[#allocation2 + $0xe0] sm:$0xff] }
  0x25   :  { %151 = vmatprep.subr.mxu0 %v590_v0  ;;  %475 = vmatprep.subr.mxu1 %v228_v15 }
  0x26   :  { %152 = vmatpush1.msra.mxu0 %v34_v16  ;;  %v212_v16 = vld [vmem:[#allocation2 + $0x60] sm:$0xff] }
  0x27   :  { %153 = vmatprep.subr.mxu0 %v590_v0  ;;  %476 = vmatpush3.msra.mxu1 %v212_v16 }
  0x28   :  { %154 = vmatpush1.msra.mxu0 %v33_v17  ;;  %v227_v17 = vld [vmem:[#allocation2 + $0xd8] sm:$0xff] }
  0x29   :  { %155 = vmatprep.subr.mxu0 %v590_v0  ;;  %477 = vmatprep.subr.mxu1 %v227_v17 }
  0x2a   :  { %156 = vmatpush1.msra.mxu0 %v32_v18  ;;  %v211_v18 = vld [vmem:[#allocation2 + $0x58] sm:$0xff] }
  0x2b   :  { %157 = vmatprep.subr.mxu0 %v590_v0  ;;  %478 = vmatpush3.msra.mxu1 %v211_v18 }
  0x2c   :  { %158 = vmatpush1.msra.mxu0 %v31_v19 }
  0x2d   :  { %159 = vmatprep.subr.mxu0 %v590_v0 }
  0x2e   :  { %v536_v21 = vpop.eup %535  ;;  %160 = vmatpush1.msra.mxu0 %v30_v20  ;;  %v226_v20 = vld [vmem:[#allocation2 + $0xd0] sm:$0xff] }
  0x2f   :  { %v54_v23 = vmul.f32 %v536_v21, %v627_v1  ;;  %189 = vmatprep.subr.mxu0 %v590_v0  ;;  %v210_v21 = vld [vmem:[#allocation2 + $0x50] sm:$0xff]  ;;  %479 = vmatprep.subr.mxu1 %v226_v20 }
  0x30   :  { %190 = vmatpush2.msra.mxu0 %v47_v22  ;;  %v225_v22 = vld [vmem:[#allocation2 + $0xc8] sm:$0xff]  ;;  %480 = vmatpush3.msra.mxu1 %v210_v21 }
  0x31   :  { %465 = vmatprep.mubr.msk.f32.mxu0 %vm77_vm0, %v54_v23  ;;  %191 = vmatprep.subr.mxu0 %v590_v0  ;;  %v209_v23 = vld [vmem:[#allocation2 + $0x48] sm:$0xff] }
  0x32   :  { %192 = vmatpush2.msra.mxu0 %v46_v24  ;;  %v224_v24 = vld [vmem:[#allocation2 + $0xc0] sm:$0xff]  ;;  %481 = vmatprep.subr.mxu1 %v225_v22 }
  0x33   :  { %482 = vmatpush3.msra.mxu1 %v209_v23 }
  0x34   :  { %483 = vmatprep.subr.mxu1 %v224_v24 }
  0x81   :  { %v57_v25 = vpop.permute.xlu0 %56 }
  0x82   :  { %v63_v26 = vpop.permute.xlu1 %62  ;;  %v78_v29 = vsel %vm77_vm0, %v627_v1, %v57_v25  ;;  %v208_v25 = vld [vmem:[#allocation2 + $0x40] sm:$0xff] }
  0x83   :  { %484 = vmatpush3.msra.mxu1 %v208_v25 }
  0x85   :  { %v60_v27 = vpop.permute.xlu0 %59 }
  0x86   :  { %v66_v28 = vpop.permute.xlu1 %65  ;;  %v80_v30 = vsel %vm79_vm1, %v78_v29, %v60_v27  ;;  %v207_v27 = vld [vmem:[#allocation2 + $0x38] sm:$0xff]  ;;  %v206_v29 = vld [vmem:[#allocation2 + $0x30] sm:$0xff] }
  0x87   :  { %v82_v31 = vsel %vm81_vm2, %v80_v30, %v63_v26  ;;  %v223_v26 = vld [vmem:[#allocation2 + $0xb8] sm:$0xff]  ;;  %v221_v30 = vld [vmem:[#allocation2 + $0xa8] sm:$0xff] }
  0x88   :  { %v84_v32 = vsel %vm83_vm3, %v82_v31, %v66_v28  ;;  %v222_v28 = vld [vmem:[#allocation2 + $0xb0] sm:$0xff]  ;;  %485 = vmatprep.subr.mxu1 %v223_v26  ;;  %v205_v31 = vld [vmem:[#allocation2 + $0x28] sm:$0xff] }
  0x89   :  { %v69_v34 = vpop.permute.xlu0 %68  ;;  %486 = vmatpush3.msra.mxu1 %v207_v27 }
  0x8a   :  { %v72_v35 = vpop.permute.xlu1 %71  ;;  %v86_v36 = vsel %vm85_vm4, %v84_v32, %v69_v34  ;;  %487 = vmatprep.subr.mxu1 %v222_v28  ;;  %v220_v32 = vld [vmem:[#allocation2 + $0xa0] sm:$0xff]  ;;  %v219_v34 = vld [vmem:[#allocation2 + $0x98] sm:$0xff]  ;;  %vm598_vm4 = vmmov 0  }
  0x8b   :  { %v88_v39 = vsel %vm87_vm5, %v86_v36, %v72_v35  ;;  %488 = vmatpush3.msra.mxu1 %v206_v29  ;;  %v203_v35 = vld [vmem:[#allocation2 + $0x18] sm:$0xff]  ;;  %v218_v36 = vld [vmem:[#allocation2 + $0x90] sm:$0xff] }
  0x8c   :  { %489 = vmatprep.subr.mxu1 %v221_v30  ;;  %v235_v29 = vld [vmem:[#allocation2 + $0x118] sm:$0xff]  ;;  %v234_v30 = vld [vmem:[#allocation2 + $0x110] sm:$0xff] }
  0x8d   :  { %v75_v38 = vpop.permute.xlu0 %74  ;;  %490 = vmatpush3.msra.mxu1 %v205_v31  ;;  %v233_v31 = vld [vmem:[#allocation2 + $0x108] sm:$0xff] }
  0x8e   :  { %v90_v40 = vsel %vm89_vm6, %v88_v39, %v75_v38  ;;  %491 = vmatprep.subr.mxu1 %v220_v32  ;;  %v202_v38 = vld [vmem:[#allocation2 + $0x10] sm:$0xff]  ;;  %v217_v39 = vld [vmem:[#allocation2 + $0x88] sm:$0xff] }
  0x8f   :  { %v464_v41 = vadd.f32 2.2, %v90_v40  ;;  %492 = vmatpush3.msra.mxu1 %v204_v33  ;;  %v201_v40 = vld [vmem:[#allocation2 + $0x8] sm:$0xff]  ;;  %v232_v33 = vld [vmem:[#allocation2 + $0x100] sm:$0xff] }
  0x90   :  { %493 = vmatprep.subr.mxu1 %v219_v34 }
  0x91   :  { %v92_v43 = vmul.f32 2.5, %v464_v41  ;;  %494 = vmatpush3.msra.mxu1 %v203_v35  ;;  %v216_v41 = vld [vmem:[#allocation2 + $0x80] sm:$0xff] }
  0x92   :  { %495 = vmatprep.subr.mxu1 %v218_v36 }
  0x93   :  { %v93_v44 = vfloor.f32 %v92_v43  ;;  %496 = vmatpush3.msra.mxu1 %v202_v38 }
  0x94   :  { %497 = vmatprep.subr.mxu1 %v217_v39 }
  0x95   :  { %v94_v46 = vsub.f32 %v92_v43, %v93_v44  ;;  %v114_v59 = vsub.f32 %v93_v44, %v113_v54  ;;  %498 = vmatpush3.msra.mxu1 %v201_v40 }
  0x96   :  { %499 = vmatprep.subr.mxu1 %v216_v41 }
  0x97   :  { %v95_v47 = vmul.f32 %v94_v46, %v94_v46  ;;  %v97_v48 = vsub.f32 1.0, %v94_v46  ;;  %vm115_vm7 = vcmp.eq.f32.partialorder %v114_v59, 0.0  ;;  %vm117_vm8 = vcmp.eq.f32.partialorder %v114_v59, 1.0  ;;  %500 = vmatpush3.msra.mxu1 %v200_v42 }
  0x98   :  { %vm120_vm9 = vcmp.eq.f32.partialorder %v114_v59, 2.0  ;;  %vm123_vm10 = vcmp.eq.f32.partialorder %v114_v59, 3.0  ;;  %509 = vmatprep.subr.mxu1 %v590_v0 }
  0x99   :  { %v96_v50 = vmul.f32 %v95_v47, %v94_v46  ;;  %v99_v51 = vmul.f32 %v97_v48, %v97_v48 }
  0x9b   :  { %v98_v52 = vmul.f32 0.16666667, %v96_v50  ;;  %v102_v53 = vmul.f32 0.5, %v96_v50  ;;  %v100_v55 = vmul.f32 %v99_v51, %v97_v48  ;;  %v273_v48 = vadd.s32 128, %v715_v37 }
  0x9d   :  { %v103_v56 = vsub.f32 %v102_v53, %v95_v47  ;;  %v105_v58 = vsub.f32 1.0, %v98_v52  ;;  %v101_v60 = vmul.f32 0.16666667, %v100_v55  ;;  %v116_v63 = vsel %vm115_vm7, %v98_v52, 0.0 }
  0x9e   :  { %v274_v53 = vcvt.s32.f32 %v273_v48 }
  0x9f   :  { %v104_v57 = vadd.f32 0.6666667, %v103_v56  ;;  %v124_v5 = vsel %vm123_vm10, %v101_v60, 0.0 }
  0xa0   :  { %v275_v56 = vadd.f32 0.5, %v274_v53 }
  0xa1   :  { %v106_v61 = vsub.f32 %v105_v58, %v104_v57  ;;  %v121_v3 = vsel %vm120_vm9, %v104_v57, 0.0 }
  0xa3   :  { %v107_v62 = vsub.f32 %v106_v61, %v101_v60  ;;  %v276_v60 = vmul.f32 0.03125, %v719_v45  ;;  %v277_v61 = vmul.f32 0.03125, %v275_v56 }
  0xa5   :  { %v118_v1 = vsel %vm117_vm8, %v107_v62, 0.0 }
  0xa6   :  { %v119_v2 = vadd.f32 %v118_v1, %v116_v63 }
  0xa8   :  { %v122_v4 = vadd.f32 %v121_v3, %v119_v2  ;;  %v278_v3 = vfloor.f32 %v276_v60 }
  0xaa   :  { %v125_v6 = vadd.f32 %v124_v5, %v122_v4  ;;  %v279_v4 = vfloor.f32 %v277_v61 }
  0xac   :  { %194 = vmatmul.mubr.f32.vlgmr.msra.gmra.mxu0 %v125_v6 }
 0x16c   :  { %v195_v7 = vpop.f32.mrf.mxu0 }
 0x16d   :  { %537 = vtanh.f32 %v195_v7 }
 0x16e   :  { %v197_v8 = vpop.f32.mrf.mxu0 }
 0x17a   :  { %v722_v19 = vpop.eup %537 }
 0x17b   :  { %247 = vrot.lane.b32.xlu0 %v722_v19, %s594_s28  ;;  %244 = vrot.lane.b32.xlu1 %v722_v19, %s593_s27  ;;  %v466_v47 = vmul.f32 -1.442695, %v722_v19  ;;  %s454_s27 = sshll.u32 %s599_s1, 4  ;;  %s455_s27 = int_to_ptr.vmem [resolvable:$true] %s454_s27 }
 0x17c   :  { %s563_s28 = scalar_lea.vmem %s455_s27, 128  ;;  %p568_p6 = scmp.lt.s32.totalorder %s455_s27, %s455_s27 }
 0x17d   :  { %539 = vpow2.f32 %v466_v47  ;;  %p564_p5 = scmp.ne.s32.totalorder %s455_s27, %s563_s28  ;;  %p569_p7 = scmp.lt.s32.totalorder %s563_s28, %s563_s28 }
 0x17f   :  { %250 = vrot.lane.b32.xlu1 %v722_v19, %s596_s5  ;;  %p570_p8 = por %p569_p7, %p568_p6 }
 0x181   :  { %p571_p9 = pnand %p570_p8, %p564_p5 }
 0x18a   :  { %v540_v2 = vpop.eup %539 }
 0x18b   :  { %v239_v9 = vadd.f32 1.0, %v540_v2 }
 0x18d   :  { %541 = vrcp.f32 %v239_v9 }
 0x19a   :  { %v542_v32 = vpop.eup %541 }
 0x19b   :  { %v242_v34 = vmul.f32 %v542_v32, %v722_v19 }
 0x1ed   :  { %v245_v43 = vpop.permute.xlu1 %244  ;;  %v248_v44 = vpop.permute.xlu0 %247 }
 0x1ee   :  { %v253_v46 = vsel %vm79_vm1, %v722_v19, %v245_v43 }
 0x1ef   :  { %v254_v49 = vsel %vm83_vm3, %v253_v46, %v248_v44 }
 0x1f1   :  { %v251_v50 = vpop.permute.xlu1 %250 }
 0x1f2   :  { %v255_v51 = vsel %vm87_vm5, %v254_v49, %v251_v50 }
 0x1f3   :  { %v467_v52 = vadd.f32 2.2, %v255_v51 }
 0x1f5   :  { %v257_v54 = vmul.f32 2.5, %v467_v52 }
 0x1f7   :  { %v258_v55 = vfloor.f32 %v257_v54 }
 0x1f9   :  { %v259_v57 = vsub.f32 %v257_v54, %v258_v55  ;;  %v280_v10 = vsub.f32 %v258_v55, %v278_v3  ;;  %v281_v11 = vsub.f32 %v258_v55, %v279_v4 }
 0x1fb   :  { %v260_v58 = vmul.f32 %v259_v57, %v259_v57  ;;  %v262_v59 = vsub.f32 1.0, %v259_v57  ;;  %vm283_vm11 = vcmp.eq.f32.partialorder %v281_v11, 0.0  ;;  %vm287_vm12 = vcmp.eq.f32.partialorder %v281_v11, 1.0 }
 0x1fc   :  { %vm282_vm13 = vcmp.eq.f32.partialorder %v280_v10, 0.0  ;;  %vm286_vm14 = vcmp.eq.f32.partialorder %v280_v10, 1.0  ;;  %vm293_vm15 = vcmp.eq.f32.partialorder %v281_v11, 2.0  ;;  %vm292_vm0 = vcmp.eq.f32.partialorder %v280_v10, 2.0 }
 0x1fd   :  { %v261_v62 = vmul.f32 %v260_v58, %v259_v57  ;;  %v264_v63 = vmul.f32 %v262_v59, %v262_v59  ;;  %vm299_vm2 = vcmp.eq.f32.partialorder %v281_v11, 3.0  ;;  %vm298_vm3 = vcmp.eq.f32.partialorder %v280_v10, 3.0 }
 0x1ff   :  { %v263_v37 = vmul.f32 0.16666667, %v261_v62  ;;  %v267_v1 = vmul.f32 0.5, %v261_v62  ;;  %v265_v5 = vmul.f32 %v264_v63, %v262_v59 }
 0x201   :  { %v268_v6 = vsub.f32 %v267_v1, %v260_v58  ;;  %v270_v8 = vsub.f32 1.0, %v263_v37  ;;  %v266_v12 = vmul.f32 0.16666667, %v265_v5  ;;  %v285_v45 = vsel %vm283_vm11, %v263_v37, 0.0 }
 0x202   :  { %v284_v16 = vsel %vm282_vm13, %v263_v37, 0.0 }
 0x203   :  { %v269_v7 = vadd.f32 0.6666667, %v268_v6  ;;  %v301_v25 = vsel %vm299_vm2, %v266_v12, 0.0  ;;  %v300_v26 = vsel %vm298_vm3, %v266_v12, 0.0 }
 0x205   :  { %v271_v13 = vsub.f32 %v270_v8, %v269_v7  ;;  %v295_v21 = vsel %vm293_vm15, %v269_v7, 0.0  ;;  %v294_v22 = vsel %vm292_vm0, %v269_v7, 0.0 }
 0x207   :  { %v272_v14 = vsub.f32 %v271_v13, %v266_v12 }
 0x209   :  { %v289_v15 = vsel %vm287_vm12, %v272_v14, 0.0  ;;  %v288_v17 = vsel %vm286_vm14, %v272_v14, 0.0 }
 0x20a   :  { %v291_v18 = vadd.f32 %v289_v15, %v285_v45  ;;  %v290_v20 = vadd.f32 %v288_v17, %v284_v16 }
 0x20c   :  { %v297_v23 = vadd.f32 %v295_v21, %v291_v18  ;;  %v296_v24 = vadd.f32 %v294_v22, %v290_v20 }
 0x20e   :  { %v303_v27 = vadd.f32 %v301_v25, %v297_v23  ;;  %v302_v28 = vadd.f32 %v300_v26, %v296_v24 }
 0x210   :  { %371 = vmatprep.mubr.f32.mxu1 %v303_v27 }
 0x211   :  { %372 = vmatmul.mubr.f32.vlgmr.msra.gmra.mxu1 %v302_v28 }
 0x212   :  { %510 = vmatpush3.msra.mxu1 %v235_v29  ;;  %517 = vmatprep.mubr.msk.f32.mxu1 %vm598_vm4, %v590_v0 }
 0x213   :  { %511 = vmatprep.subr.mxu1 %v590_v0 }
 0x214   :  { %512 = vmatpush3.msra.mxu1 %v234_v30 }
 0x215   :  { %513 = vmatprep.subr.mxu1 %v590_v0 }
 0x216   :  { %514 = vmatpush3.msra.mxu1 %v233_v31 }
 0x217   :  { %515 = vmatprep.subr.mxu1 %v590_v0 }
 0x218   :  { %516 = vmatpush3.msra.mxu1 %v232_v33 }
 0x219   :  { %518 = vmatmul.mubr.msk.f32.vlgmr.msra.gmra.mxu1 %vm79_vm1, %v242_v34 }
 0x2d1   :  { %v501_v35 = vpop.f32.mrf.mxu1 }
 0x2d3   :  { %v502_v36 = vpop.f32.mrf.mxu1 }
 0x2d4   :  { %v503_v38 = vadd.f32 %v502_v36, %v501_v35 }
 0x2d9   :  { %v443_v39 = vpop.f32.mrf.mxu1 }
 0x2da   :  { %v444_v40 = vadd.f32 %v503_v38, %v443_v39 }
 0x2db   :  { %v519_v41 = vpop.f32.mrf.mxu1 }
 0x2dc   :  { %447 = vst [vmem:[#allocation5] sm:$0xff] %v444_v40 }
 0x2dd   :  { %574 = shalt.err (!%p571_p9)
}
 0x2de   :  { %457 = dma.vmem_to_hbm [thread:$0]  %s455_s27, 128, %s750_s3, [#allocation4]  }
 0x2df   :  { %585 = dma.done.wait [#allocation4], 128  }
 0x2e0   :  { %586 = vsyncadd [#allocation4], 4294967168 }
 0x2e1   :  { %461 = vsyncpa [#allocation3], 1 }
 0x2e2   :  { %462 = vsyncpa [#allocation4], 1 }

// kernel: tpu_custom_call.1
= control target key start
LH: loop header
LB: loop body
LE: loop exit
PB: predicated region body
PF: predicated region fallthrough
CT: control target
= control target key end

     0   :  { %8 = vsyncpa [#allocation3], 0  ;;  %s747_s0 = inlined_call_operand.vmem [shape: f32[8,16], index: 0, kind: input, shape index: {}]   ;;  %s748_s1 = inlined_call_operand.vmem [shape: f32[144,32], index: 1, kind: input, shape index: {}]   ;;  %s749_s2 = inlined_call_operand.hbm [shape: f32[288,128], index: 2, kind: input, shape index: {}]   ;;  %s750_s3 = inlined_call_operand.hbm [shape: f32[8,128], index: 3, kind: output, shape index: {}]  }
   0x1   :  { %9 = vsyncpa [#allocation4], 0  ;;  %s587_s12 = smov [#allocation2]  }
   0x2   :  { %s19_s13 = sshll.u32 %s587_s12, 4  ;;  %s20_s13 = int_to_ptr.vmem [resolvable:$true] %s19_s13 }
   0x3   :  { %s551_s14 = scalar_lea.vmem %s20_s13, 4608  ;;  %p556_p1 = scmp.lt.s32.totalorder %s20_s13, %s20_s13 }
   0x4   :  { %p552_p0 = scmp.ne.s32.totalorder %s20_s13, %s551_s14  ;;  %p557_p2 = scmp.lt.s32.totalorder %s551_s14, %s551_s14 }
   0x6   :  { %p558_p3 = por %p557_p2, %p556_p1 }
   0x8   :  { %p559_p4 = pnand %p558_p3, %p552_p0 }
   0xa   :  { %562 = shalt.err (!%p559_p4)
}
   0xb   :  { %s588_s15 = smov 128   ;;  %s589_s16 = smov 8  }
   0xc   :  { %25 = dma.hbm_to_vmem [thread:$0]  %s749_s2, 4608, %s20_s13, [#allocation3], %s588_s15, %s588_s15, %s589_s16  }
   0xd   :  { %583 = dma.done.wait [#allocation3], 4608  }
   0xe   :  { %584 = vsyncadd [#allocation3], 4294962688  ;;  %v590_v0 = vmov 0.0   ;;  %v627_v1 = vld [vmem:[%s747_s0] sm:$0xff]  ;;  %v45_v2 = vld [vmem:[%s748_s1 + $0x78] sm:$0xff]  ;;  %s591_s23 = smov 16   ;;  %v108_v33 = vlaneseq }
   0xf   :  { %129 = vmatprep.subr.mxu0 %v590_v0  ;;  %56 = vrot.lane.b32.xlu0 %v627_v1, %s591_s23  ;;  %s592_s24 = smov 48   ;;  %v44_v3 = vld [vmem:[%s748_s1 + $0x70] sm:$0xff]  ;;  %v463_v4 = vmul.f32 -1.442695, %v627_v1  ;;  %v43_v5 = vld [vmem:[%s748_s1 + $0x68] sm:$0xff]  ;;  %s593_s27 = smov 32  }
  0x10   :  { %62 = vrot.lane.b32.xlu1 %v627_v1, %s592_s24  ;;  %130 = vmatpush1.msra.mxu0 %v45_v2  ;;  %s594_s28 = smov 64   ;;  %v42_v6 = vld [vmem:[%s748_s1 + $0x60] sm:$0xff]  ;;  %s595_s4 = smov 80   ;;  %v41_v7 = vld [vmem:[%s748_s1 + $0x58] sm:$0xff]  ;;  %v40_v8 = vld [vmem:[%s748_s1 + $0x50] sm:$0xff]  ;;  %vm77_vm0 = vcmask 130048  }
  0x11   :  { %131 = vmatprep.subr.mxu0 %v590_v0  ;;  %533 = vpow2.f32 %v463_v4  ;;  %s596_s5 = smov 96   ;;  %s597_s10 = smov 112   ;;  %v39_v9 = vld [vmem:[%s748_s1 + $0x48] sm:$0xff]  ;;  %v38_v10 = vld [vmem:[%s748_s1 + $0x40] sm:$0xff]  ;;  %v37_v12 = vld [vmem:[%s748_s1 + $0x38] sm:$0xff]  ;;  %vm79_vm1 = vcmask 261120  }
  0x12   :  { %132 = vmatpush1.msra.mxu0 %v44_v3  ;;  %v36_v14 = vld [vmem:[%s748_s1 + $0x30] sm:$0xff]  ;;  %v35_v15 = vld [vmem:[%s748_s1 + $0x28] sm:$0xff]  ;;  %v34_v16 = vld [vmem:[%s748_s1 + $0x20] sm:$0xff]  ;;  %vm81_vm2 = vcmask 392192   ;;  %vm83_vm3 = vcmask 523264   ;;  %vm85_vm4 = vcmask 654336  }
  0x13   :  { %59 = vrot.lane.b32.xlu0 %v627_v1, %s593_s27  ;;  %133 = vmatprep.subr.mxu0 %v590_v0  ;;  %v33_v17 = vld [vmem:[%s748_s1 + $0x18] sm:$0xff]  ;;  %v32_v18 = vld [vmem:[%s748_s1 + $0x10] sm:$0xff]  ;;  %v31_v19 = vld [vmem:[%s748_s1 + $0x8] sm:$0xff]  ;;  %vm87_vm5 = vcmask 785408   ;;  %vm89_vm6 = vcmask 916480   ;;  %v715_v37 = vand.u32 127, %v108_v33 }
  0x14   :  { %65 = vrot.lane.b32.xlu1 %v627_v1, %s594_s28  ;;  %134 = vmatpush1.msra.mxu0 %v43_v5  ;;  %v30_v20 = vld [vmem:[%s748_s1] sm:$0xff]  ;;  %v47_v22 = vld [vmem:[%s748_s1 + $0x88] sm:$0xff] }
  0x15   :  { %135 = vmatprep.subr.mxu0 %v590_v0  ;;  %v46_v24 = vld [vmem:[%s748_s1 + $0x80] sm:$0xff]  ;;  %v110_v42 = vcvt.s32.f32 %v715_v37  ;;  %s599_s1 = smov [#allocation5]  }
  0x16   :  { %136 = vmatpush1.msra.mxu0 %v42_v6  ;;  %v204_v33 = vld [vmem:[#allocation2 + $0x20] sm:$0xff] }
  0x17   :  { %68 = vrot.lane.b32.xlu0 %v627_v1, %s595_s4  ;;  %137 = vmatprep.subr.mxu0 %v590_v0  ;;  %v719_v45 = vadd.f32 0.5, %v110_v42  ;;  %v200_v42 = vld [vmem:[#allocation2] sm:$0xff] }
  0x18   :  { %71 = vrot.lane.b32.xlu1 %v627_v1, %s596_s5  ;;  %138 = vmatpush1.msra.mxu0 %v41_v7 }
  0x19   :  { %139 = vmatprep.subr.mxu0 %v590_v0  ;;  %v112_v49 = vmul.f32 0.0625, %v719_v45 }
  0x1a   :  { %140 = vmatpush1.msra.mxu0 %v40_v8 }
  0x1b   :  { %74 = vrot.lane.b32.xlu0 %v627_v1, %s597_s10  ;;  %141 = vmatprep.subr.mxu0 %v590_v0  ;;  %v113_v54 = vfloor.f32 %v112_v49 }
  0x1c   :  { %142 = vmatpush1.msra.mxu0 %v39_v9  ;;  %v231_v9 = vld [vmem:[#allocation2 + $0xf8] sm:$0xff] }
  0x1d   :  { %143 = vmatprep.subr.mxu0 %v590_v0  ;;  %469 = vmatprep.subr.mxu1 %v231_v9 }
  0x1e   :  { %v534_v11 = vpop.eup %533  ;;  %144 = vmatpush1.msra.mxu0 %v38_v10  ;;  %v215_v10 = vld [vmem:[#allocation2 + $0x78] sm:$0xff] }
  0x1f   :  { %v51_v13 = vadd.f32 1.0, %v534_v11  ;;  %145 = vmatprep.subr.mxu0 %v590_v0  ;;  %470 = vmatpush3.msra.mxu1 %v215_v10  ;;  %v230_v11 = vld [vmem:[#allocation2 + $0xf0] sm:$0xff] }
  0x20   :  { %146 = vmatpush1.msra.mxu0 %v37_v12  ;;  %471 = vmatprep.subr.mxu1 %v230_v11  ;;  %v214_v12 = vld [vmem:[#allocation2 + $0x70] sm:$0xff] }
  0x21   :  { %535 = vrcp.f32 %v51_v13  ;;  %147 = vmatprep.subr.mxu0 %v590_v0  ;;  %472 = vmatpush3.msra.mxu1 %v214_v12  ;;  %v229_v13 = vld [vmem:[#allocation2 + $0xe8] sm:$0xff] }
  0x22   :  { %148 = vmatpush1.msra.mxu0 %v36_v14  ;;  %473 = vmatprep.subr.mxu1 %v229_v13  ;;  %v213_v14 = vld [vmem:[#allocation2 + $0x68] sm:$0xff] }
  0x23   :  { %149 = vmatprep.subr.mxu0 %v590_v0  ;;  %474 = vmatpush3.msra.mxu1 %v213_v14 }
  0x24   :  { %150 = vmatpush1.msra.mxu0 %v35_v15  ;;  %v228_v15 = vld [vmem:[#allocation2 + $0xe0] sm:$0xff] }
  0x25   :  { %151 = vmatprep.subr.mxu0 %v590_v0  ;;  %475 = vmatprep.subr.mxu1 %v228_v15 }
  0x26   :  { %152 = vmatpush1.msra.mxu0 %v34_v16  ;;  %v212_v16 = vld [vmem:[#allocation2 + $0x60] sm:$0xff] }
  0x27   :  { %153 = vmatprep.subr.mxu0 %v590_v0  ;;  %476 = vmatpush3.msra.mxu1 %v212_v16 }
  0x28   :  { %154 = vmatpush1.msra.mxu0 %v33_v17  ;;  %v227_v17 = vld [vmem:[#allocation2 + $0xd8] sm:$0xff] }
  0x29   :  { %155 = vmatprep.subr.mxu0 %v590_v0  ;;  %477 = vmatprep.subr.mxu1 %v227_v17 }
  0x2a   :  { %156 = vmatpush1.msra.mxu0 %v32_v18  ;;  %v211_v18 = vld [vmem:[#allocation2 + $0x58] sm:$0xff] }
  0x2b   :  { %157 = vmatprep.subr.mxu0 %v590_v0  ;;  %478 = vmatpush3.msra.mxu1 %v211_v18 }
  0x2c   :  { %158 = vmatpush1.msra.mxu0 %v31_v19 }
  0x2d   :  { %159 = vmatprep.subr.mxu0 %v590_v0 }
  0x2e   :  { %v536_v21 = vpop.eup %535  ;;  %160 = vmatpush1.msra.mxu0 %v30_v20  ;;  %v226_v20 = vld [vmem:[#allocation2 + $0xd0] sm:$0xff] }
  0x2f   :  { %v54_v23 = vmul.f32 %v536_v21, %v627_v1  ;;  %189 = vmatprep.subr.mxu0 %v590_v0  ;;  %v210_v21 = vld [vmem:[#allocation2 + $0x50] sm:$0xff]  ;;  %479 = vmatprep.subr.mxu1 %v226_v20 }
  0x30   :  { %190 = vmatpush2.msra.mxu0 %v47_v22  ;;  %v225_v22 = vld [vmem:[#allocation2 + $0xc8] sm:$0xff]  ;;  %480 = vmatpush3.msra.mxu1 %v210_v21 }
  0x31   :  { %465 = vmatprep.mubr.msk.f32.mxu0 %vm77_vm0, %v54_v23  ;;  %191 = vmatprep.subr.mxu0 %v590_v0  ;;  %v209_v23 = vld [vmem:[#allocation2 + $0x48] sm:$0xff] }
  0x32   :  { %192 = vmatpush2.msra.mxu0 %v46_v24  ;;  %v224_v24 = vld [vmem:[#allocation2 + $0xc0] sm:$0xff]  ;;  %481 = vmatprep.subr.mxu1 %v225_v22 }
  0x33   :  { %482 = vmatpush3.msra.mxu1 %v209_v23 }
  0x34   :  { %483 = vmatprep.subr.mxu1 %v224_v24 }
  0x81   :  { %v57_v25 = vpop.permute.xlu0 %56 }
  0x82   :  { %v63_v26 = vpop.permute.xlu1 %62  ;;  %v78_v29 = vsel %vm77_vm0, %v627_v1, %v57_v25  ;;  %v208_v25 = vld [vmem:[#allocation2 + $0x40] sm:$0xff] }
  0x83   :  { %484 = vmatpush3.msra.mxu1 %v208_v25 }
  0x85   :  { %v60_v27 = vpop.permute.xlu0 %59 }
  0x86   :  { %v66_v28 = vpop.permute.xlu1 %65  ;;  %v80_v30 = vsel %vm79_vm1, %v78_v29, %v60_v27  ;;  %v207_v27 = vld [vmem:[#allocation2 + $0x38] sm:$0xff]  ;;  %v206_v29 = vld [vmem:[#allocation2 + $0x30] sm:$0xff] }
  0x87   :  { %v82_v31 = vsel %vm81_vm2, %v80_v30, %v63_v26  ;;  %v223_v26 = vld [vmem:[#allocation2 + $0xb8] sm:$0xff]  ;;  %v221_v30 = vld [vmem:[#allocation2 + $0xa8] sm:$0xff] }
  0x88   :  { %v84_v32 = vsel %vm83_vm3, %v82_v31, %v66_v28  ;;  %v222_v28 = vld [vmem:[#allocation2 + $0xb0] sm:$0xff]  ;;  %485 = vmatprep.subr.mxu1 %v223_v26  ;;  %v205_v31 = vld [vmem:[#allocation2 + $0x28] sm:$0xff] }
  0x89   :  { %v69_v34 = vpop.permute.xlu0 %68  ;;  %486 = vmatpush3.msra.mxu1 %v207_v27 }
  0x8a   :  { %v72_v35 = vpop.permute.xlu1 %71  ;;  %v86_v36 = vsel %vm85_vm4, %v84_v32, %v69_v34  ;;  %487 = vmatprep.subr.mxu1 %v222_v28  ;;  %v220_v32 = vld [vmem:[#allocation2 + $0xa0] sm:$0xff]  ;;  %v219_v34 = vld [vmem:[#allocation2 + $0x98] sm:$0xff]  ;;  %vm598_vm4 = vmmov 0  }
  0x8b   :  { %v88_v39 = vsel %vm87_vm5, %v86_v36, %v72_v35  ;;  %488 = vmatpush3.msra.mxu1 %v206_v29  ;;  %v203_v35 = vld [vmem:[#allocation2 + $0x18] sm:$0xff]  ;;  %v218_v36 = vld [vmem:[#allocation2 + $0x90] sm:$0xff] }
  0x8c   :  { %489 = vmatprep.subr.mxu1 %v221_v30  ;;  %v235_v29 = vld [vmem:[#allocation2 + $0x118] sm:$0xff]  ;;  %v234_v30 = vld [vmem:[#allocation2 + $0x110] sm:$0xff] }
  0x8d   :  { %v75_v38 = vpop.permute.xlu0 %74  ;;  %490 = vmatpush3.msra.mxu1 %v205_v31  ;;  %v233_v31 = vld [vmem:[#allocation2 + $0x108] sm:$0xff] }
  0x8e   :  { %v90_v40 = vsel %vm89_vm6, %v88_v39, %v75_v38  ;;  %491 = vmatprep.subr.mxu1 %v220_v32  ;;  %v202_v38 = vld [vmem:[#allocation2 + $0x10] sm:$0xff]  ;;  %v217_v39 = vld [vmem:[#allocation2 + $0x88] sm:$0xff] }
  0x8f   :  { %v464_v41 = vadd.f32 2.2, %v90_v40  ;;  %492 = vmatpush3.msra.mxu1 %v204_v33  ;;  %v201_v40 = vld [vmem:[#allocation2 + $0x8] sm:$0xff]  ;;  %v232_v33 = vld [vmem:[#allocation2 + $0x100] sm:$0xff] }
  0x90   :  { %493 = vmatprep.subr.mxu1 %v219_v34 }
  0x91   :  { %v92_v43 = vmul.f32 2.5, %v464_v41  ;;  %494 = vmatpush3.msra.mxu1 %v203_v35  ;;  %v216_v41 = vld [vmem:[#allocation2 + $0x80] sm:$0xff] }
  0x92   :  { %495 = vmatprep.subr.mxu1 %v218_v36 }
  0x93   :  { %v93_v44 = vfloor.f32 %v92_v43  ;;  %496 = vmatpush3.msra.mxu1 %v202_v38 }
  0x94   :  { %497 = vmatprep.subr.mxu1 %v217_v39 }
  0x95   :  { %v94_v46 = vsub.f32 %v92_v43, %v93_v44  ;;  %v114_v59 = vsub.f32 %v93_v44, %v113_v54  ;;  %498 = vmatpush3.msra.mxu1 %v201_v40 }
  0x96   :  { %499 = vmatprep.subr.mxu1 %v216_v41 }
  0x97   :  { %v95_v47 = vmul.f32 %v94_v46, %v94_v46  ;;  %v97_v48 = vsub.f32 1.0, %v94_v46  ;;  %vm115_vm7 = vcmp.eq.f32.partialorder %v114_v59, 0.0  ;;  %vm117_vm8 = vcmp.eq.f32.partialorder %v114_v59, 1.0  ;;  %500 = vmatpush3.msra.mxu1 %v200_v42 }
  0x98   :  { %vm120_vm9 = vcmp.eq.f32.partialorder %v114_v59, 2.0  ;;  %vm123_vm10 = vcmp.eq.f32.partialorder %v114_v59, 3.0  ;;  %509 = vmatprep.subr.mxu1 %v590_v0 }
  0x99   :  { %v96_v50 = vmul.f32 %v95_v47, %v94_v46  ;;  %v99_v51 = vmul.f32 %v97_v48, %v97_v48 }
  0x9b   :  { %v98_v52 = vmul.f32 0.16666667, %v96_v50  ;;  %v102_v53 = vmul.f32 0.5, %v96_v50  ;;  %v100_v55 = vmul.f32 %v99_v51, %v97_v48  ;;  %v273_v48 = vadd.s32 128, %v715_v37 }
  0x9d   :  { %v103_v56 = vsub.f32 %v102_v53, %v95_v47  ;;  %v105_v58 = vsub.f32 1.0, %v98_v52  ;;  %v101_v60 = vmul.f32 0.16666667, %v100_v55  ;;  %v116_v63 = vsel %vm115_vm7, %v98_v52, 0.0 }
  0x9e   :  { %v274_v53 = vcvt.s32.f32 %v273_v48 }
  0x9f   :  { %v104_v57 = vadd.f32 0.6666667, %v103_v56  ;;  %v124_v5 = vsel %vm123_vm10, %v101_v60, 0.0 }
  0xa0   :  { %v275_v56 = vadd.f32 0.5, %v274_v53 }
  0xa1   :  { %v106_v61 = vsub.f32 %v105_v58, %v104_v57  ;;  %v121_v3 = vsel %vm120_vm9, %v104_v57, 0.0 }
  0xa3   :  { %v107_v62 = vsub.f32 %v106_v61, %v101_v60  ;;  %v276_v60 = vmul.f32 0.03125, %v719_v45  ;;  %v277_v61 = vmul.f32 0.03125, %v275_v56 }
  0xa5   :  { %v118_v1 = vsel %vm117_vm8, %v107_v62, 0.0 }
  0xa6   :  { %v119_v2 = vadd.f32 %v118_v1, %v116_v63 }
  0xa8   :  { %v122_v4 = vadd.f32 %v121_v3, %v119_v2  ;;  %v278_v3 = vfloor.f32 %v276_v60 }
  0xaa   :  { %v125_v6 = vadd.f32 %v124_v5, %v122_v4  ;;  %v279_v4 = vfloor.f32 %v277_v61 }
  0xac   :  { %194 = vmatmul.mubr.f32.vlgmr.msra.gmra.mxu0 %v125_v6 }
 0x16c   :  { %v195_v7 = vpop.f32.mrf.mxu0 }
 0x16d   :  { %537 = vtanh.f32 %v195_v7 }
 0x16e   :  { %v197_v8 = vpop.f32.mrf.mxu0 }
 0x17a   :  { %v722_v19 = vpop.eup %537 }
 0x17b   :  { %247 = vrot.lane.b32.xlu0 %v722_v19, %s594_s28  ;;  %244 = vrot.lane.b32.xlu1 %v722_v19, %s593_s27  ;;  %v466_v47 = vmul.f32 -1.442695, %v722_v19  ;;  %s454_s27 = sshll.u32 %s599_s1, 4  ;;  %s455_s27 = int_to_ptr.vmem [resolvable:$true] %s454_s27 }
 0x17c   :  { %s563_s28 = scalar_lea.vmem %s455_s27, 128  ;;  %p568_p6 = scmp.lt.s32.totalorder %s455_s27, %s455_s27 }
 0x17d   :  { %539 = vpow2.f32 %v466_v47  ;;  %p564_p5 = scmp.ne.s32.totalorder %s455_s27, %s563_s28  ;;  %p569_p7 = scmp.lt.s32.totalorder %s563_s28, %s563_s28 }
 0x17f   :  { %250 = vrot.lane.b32.xlu1 %v722_v19, %s596_s5  ;;  %p570_p8 = por %p569_p7, %p568_p6 }
 0x181   :  { %p571_p9 = pnand %p570_p8, %p564_p5 }
 0x18a   :  { %v540_v2 = vpop.eup %539 }
 0x18b   :  { %v239_v9 = vadd.f32 1.0, %v540_v2 }
 0x18d   :  { %541 = vrcp.f32 %v239_v9 }
 0x19a   :  { %v542_v32 = vpop.eup %541 }
 0x19b   :  { %v242_v34 = vmul.f32 %v542_v32, %v722_v19 }
 0x1ed   :  { %v245_v43 = vpop.permute.xlu1 %244  ;;  %v248_v44 = vpop.permute.xlu0 %247 }
 0x1ee   :  { %v253_v46 = vsel %vm79_vm1, %v722_v19, %v245_v43 }
 0x1ef   :  { %v254_v49 = vsel %vm83_vm3, %v253_v46, %v248_v44 }
 0x1f1   :  { %v251_v50 = vpop.permute.xlu1 %250 }
 0x1f2   :  { %v255_v51 = vsel %vm87_vm5, %v254_v49, %v251_v50 }
 0x1f3   :  { %v467_v52 = vadd.f32 2.2, %v255_v51 }
 0x1f5   :  { %v257_v54 = vmul.f32 2.5, %v467_v52 }
 0x1f7   :  { %v258_v55 = vfloor.f32 %v257_v54 }
 0x1f9   :  { %v259_v57 = vsub.f32 %v257_v54, %v258_v55  ;;  %v280_v10 = vsub.f32 %v258_v55, %v278_v3  ;;  %v281_v11 = vsub.f32 %v258_v55, %v279_v4 }
 0x1fb   :  { %v260_v58 = vmul.f32 %v259_v57, %v259_v57  ;;  %v262_v59 = vsub.f32 1.0, %v259_v57  ;;  %vm283_vm11 = vcmp.eq.f32.partialorder %v281_v11, 0.0  ;;  %vm287_vm12 = vcmp.eq.f32.partialorder %v281_v11, 1.0 }
 0x1fc   :  { %vm282_vm13 = vcmp.eq.f32.partialorder %v280_v10, 0.0  ;;  %vm286_vm14 = vcmp.eq.f32.partialorder %v280_v10, 1.0  ;;  %vm293_vm15 = vcmp.eq.f32.partialorder %v281_v11, 2.0  ;;  %vm292_vm0 = vcmp.eq.f32.partialorder %v280_v10, 2.0 }
 0x1fd   :  { %v261_v62 = vmul.f32 %v260_v58, %v259_v57  ;;  %v264_v63 = vmul.f32 %v262_v59, %v262_v59  ;;  %vm299_vm2 = vcmp.eq.f32.partialorder %v281_v11, 3.0  ;;  %vm298_vm3 = vcmp.eq.f32.partialorder %v280_v10, 3.0 }
 0x1ff   :  { %v263_v37 = vmul.f32 0.16666667, %v261_v62  ;;  %v267_v1 = vmul.f32 0.5, %v261_v62  ;;  %v265_v5 = vmul.f32 %v264_v63, %v262_v59 }
 0x201   :  { %v268_v6 = vsub.f32 %v267_v1, %v260_v58  ;;  %v270_v8 = vsub.f32 1.0, %v263_v37  ;;  %v266_v12 = vmul.f32 0.16666667, %v265_v5  ;;  %v285_v45 = vsel %vm283_vm11, %v263_v37, 0.0 }
 0x202   :  { %v284_v16 = vsel %vm282_vm13, %v263_v37, 0.0 }
 0x203   :  { %v269_v7 = vadd.f32 0.6666667, %v268_v6  ;;  %v301_v25 = vsel %vm299_vm2, %v266_v12, 0.0  ;;  %v300_v26 = vsel %vm298_vm3, %v266_v12, 0.0 }
 0x205   :  { %v271_v13 = vsub.f32 %v270_v8, %v269_v7  ;;  %v295_v21 = vsel %vm293_vm15, %v269_v7, 0.0  ;;  %v294_v22 = vsel %vm292_vm0, %v269_v7, 0.0 }
 0x207   :  { %v272_v14 = vsub.f32 %v271_v13, %v266_v12 }
 0x209   :  { %v289_v15 = vsel %vm287_vm12, %v272_v14, 0.0  ;;  %v288_v17 = vsel %vm286_vm14, %v272_v14, 0.0 }
 0x20a   :  { %v291_v18 = vadd.f32 %v289_v15, %v285_v45  ;;  %v290_v20 = vadd.f32 %v288_v17, %v284_v16 }
 0x20c   :  { %v297_v23 = vadd.f32 %v295_v21, %v291_v18  ;;  %v296_v24 = vadd.f32 %v294_v22, %v290_v20 }
 0x20e   :  { %v303_v27 = vadd.f32 %v301_v25, %v297_v23  ;;  %v302_v28 = vadd.f32 %v300_v26, %v296_v24 }
 0x210   :  { %371 = vmatprep.mubr.f32.mxu1 %v303_v27 }
 0x211   :  { %372 = vmatmul.mubr.f32.vlgmr.msra.gmra.mxu1 %v302_v28 }
 0x212   :  { %510 = vmatpush3.msra.mxu1 %v235_v29  ;;  %517 = vmatprep.mubr.msk.f32.mxu1 %vm598_vm4, %v590_v0 }
 0x213   :  { %511 = vmatprep.subr.mxu1 %v590_v0 }
 0x214   :  { %512 = vmatpush3.msra.mxu1 %v234_v30 }
 0x215   :  { %513 = vmatprep.subr.mxu1 %v590_v0 }
 0x216   :  { %514 = vmatpush3.msra.mxu1 %v233_v31 }
 0x217   :  { %515 = vmatprep.subr.mxu1 %v590_v0 }
 0x218   :  { %516 = vmatpush3.msra.mxu1 %v232_v33 }
 0x219   :  { %518 = vmatmul.mubr.msk.f32.vlgmr.msra.gmra.mxu1 %vm79_vm1, %v242_v34 }
 0x2d1   :  { %v501_v35 = vpop.f32.mrf.mxu1 }
 0x2d3   :  { %v502_v36 = vpop.f32.mrf.mxu1 }
 0x2d4   :  { %v503_v38 = vadd.f32 %v502_v36, %v501_v35 }
 0x2d9   :  { %v443_v39 = vpop.f32.mrf.mxu1 }
 0x2da   :  { %v444_v40 = vadd.f32 %v503_v38, %v443_v39 }
 0x2db   :  { %v519_v41 = vpop.f32.mrf.mxu1 }
 0x2dc   :  { %447 = vst [vmem:[#allocation5] sm:$0xff] %v444_v40 }
 0x2dd   :  { %574 = shalt.err (!%p571_p9)
}
 0x2de   :  { %457 = dma.vmem_to_hbm [thread:$0]  %s455_s27, 128, %s750_s3, [#allocation4]  }
 0x2df   :  { %585 = dma.done.wait [#allocation4], 128  }
 0x2e0   :  { %586 = vsyncadd [#allocation4], 4294967168 }
 0x2e1   :  { %461 = vsyncpa [#allocation3], 1 }
 0x2e2   :  { %462 = vsyncpa [#allocation4], 1 }

</bundles_post_ra>
